<compile_context>
chip_gen: v7x
topology: tpu7x:2x2x1
jax: 0.10.0
libtpu: 0.0.40
codegen_flags: <defaults>
</compile_context>

<pallas_src>
import jax
import jax.numpy as jnp
from jax import lax
from jax.experimental import pallas as pl
from jax.experimental.pallas import tpu as pltpu


def _linear_relu_le_kernel(x_ref, w_ref, relu_ref, mask_ref):
    """Single-K-block path: whole contraction in one shot, no scratch."""
    # x tile: (tm, K), w tile: (tn, K); contract the last axis of both.
    s = lax.dot_general(
        x_ref[...], w_ref[...],
        dimension_numbers=(((1,), (1,)), ((), ())),
        preferred_element_type=jnp.float32,
    )
    relu_ref[...] = jnp.maximum(s, 0.0).astype(relu_ref.dtype)
    # relu <= 0  <=>  s <= 0 (relu is max(s, 0)); int8 keeps HBM writes small.
    mask_ref[...] = (s <= 0.0).astype(mask_ref.dtype)


def _linear_relu_le_kernel_ksplit(x_ref, w_ref, relu_ref, mask_ref, acc_ref):
    """K-split path for large K: f32 accumulator across the k grid axis."""
    @pl.when(pl.program_id(2) == 0)
    def _():
        acc_ref[...] = jnp.zeros_like(acc_ref)

    acc_ref[...] += lax.dot_general(
        x_ref[...], w_ref[...],
        dimension_numbers=(((1,), (1,)), ((), ())),
        preferred_element_type=jnp.float32,
    )

    @pl.when(pl.program_id(2) == pl.num_programs(2) - 1)
    def _():
        s = acc_ref[...]
        relu_ref[...] = jnp.maximum(s, 0.0).astype(relu_ref.dtype)
        mask_ref[...] = (s <= 0.0).astype(mask_ref.dtype)


def _pick_tile(dim, preferred):
    for t in preferred:
        if t <= dim and dim % t == 0:
            return t
    return dim  # full-extent block (always legal: block == full array dim)


def linear_relu_with_mask(primals_1, primals_2, *, tm=None, tn=None, tk=None):
    """Pallas equivalent of Repro.forward.

    primals_1: weight [N, K] (torch.nn.Linear layout)
    primals_2: input  [M, K]
    returns [relu, primals_2, le]
    """
    w = primals_1  # [N, K]
    x = primals_2  # [M, K]
    M, K = x.shape
    N, K2 = w.shape
    assert K == K2

    # Lane-dense tiles preferred (N multiple of 128); toy shapes fall back to
    # full-array blocks.
    tm = tm or _pick_tile(M, (512, 256, 128))
    tn = tn or _pick_tile(N, (512, 256, 128))
    tk = tk or _pick_tile(K, (2048, 1024, 512))
    if (M % tm) or (N % tn) or (K % tk):
        tm, tn, tk = M, N, K  # safety fallback for user-supplied tiles

    out_shape = (
        jax.ShapeDtypeStruct((M, N), x.dtype),   # relu
        jax.ShapeDtypeStruct((M, N), jnp.int8),  # mask (cast to bool outside)
    )

    if tk == K:
        # Entire reduction in one block: no scratch, 2-D parallel grid.
        relu_out, mask_i8 = pl.pallas_call(
            _linear_relu_le_kernel,
            out_shape=out_shape,
            grid_spec=pltpu.PrefetchScalarGridSpec(
                num_scalar_prefetch=0,
                grid=(M // tm, N // tn),
                in_specs=[
                    pl.BlockSpec((tm, tk), lambda i, j: (i, 0)),  # x
                    pl.BlockSpec((tn, tk), lambda i, j: (j, 0)),  # w
                ],
                out_specs=[
                    pl.BlockSpec((tm, tn), lambda i, j: (i, j)),
                    pl.BlockSpec((tm, tn), lambda i, j: (i, j)),
                ],
            ),
            compiler_params=pltpu.CompilerParams(
                dimension_semantics=("parallel", "parallel")),
        )(x, w)
    else:
        # Large K: tile the reduction with a resident f32 accumulator.
        relu_out, mask_i8 = pl.pallas_call(
            _linear_relu_le_kernel_ksplit,
            out_shape=out_shape,
            grid_spec=pltpu.PrefetchScalarGridSpec(
                num_scalar_prefetch=0,
                grid=(M // tm, N // tn, K // tk),
                in_specs=[
                    pl.BlockSpec((tm, tk), lambda i, j, k: (i, k)),  # x
                    pl.BlockSpec((tn, tk), lambda i, j, k: (j, k)),  # w
                ],
                out_specs=[
                    pl.BlockSpec((tm, tn), lambda i, j, k: (i, j)),
                    pl.BlockSpec((tm, tn), lambda i, j, k: (i, j)),
                ],
                scratch_shapes=[pltpu.VMEM((tm, tn), jnp.float32)],
            ),
            compiler_params=pltpu.CompilerParams(
                dimension_semantics=("parallel", "parallel", "arbitrary")),
        )(x, w)

    le = (mask_i8 != 0)  # aten.le.Scalar returns bool
    return [relu_out, primals_2, le]


if __name__ == "__main__":
    key = jax.random.PRNGKey(0)
    k1, k2 = jax.random.split(key)

    M, K, N = 8, 32, 16  # batch, in_features, out_features (small toy shapes)
    primals_1 = jax.random.normal(k1, (N, K), dtype=jnp.float32)  # weight
    primals_2 = jax.random.normal(k2, (M, K), dtype=jnp.float32)  # input

    relu_out, x_out, le_out = linear_relu_with_mask(primals_1, primals_2)
    jax.block_until_ready((relu_out, x_out, le_out))

    # sanity check against plain-JAX reference
    ref_relu = jnp.maximum(primals_2 @ primals_1.T, 0.0)
    assert jnp.allclose(relu_out, ref_relu, atol=1e-5, rtol=1e-5)
    assert bool(jnp.all(le_out == (ref_relu <= 0.0)))
    assert le_out.dtype == jnp.bool_
    assert bool(jnp.all(x_out == primals_2))

    print("KERNEL_OK")
</pallas_src>

<mosaic_0001>
module attributes {stable_mosaic.version = 11 : i64} {
  func.func @_linear_relu_le_kernel(%arg0: i32, %arg1: i32, %arg2: memref<8x32xf32, #tpu.memory_space<vmem>>, %arg3: memref<16x32xf32, #tpu.memory_space<vmem>>, %arg4: memref<8x16xf32, #tpu.memory_space<vmem>>, %arg5: memref<8x16xi8, #tpu.memory_space<vmem>>) attributes {dimension_semantics = [#tpu.dimension_semantics<parallel>, #tpu.dimension_semantics<parallel>], iteration_bounds = array<i64: 1, 1>, scalar_prefetch = 0 : i64, scratch_operands = 0 : i64, tpu.core_type = #tpu.core_type<tc>, window_params = [{transform_indices = @transform_0, window_bounds = array<i64: 8, 32>}, {transform_indices = @transform_1, window_bounds = array<i64: 16, 32>}, {transform_indices = @transform_2, window_bounds = array<i64: 8, 16>}, {transform_indices = @transform_3, window_bounds = array<i64: 8, 16>}]} {
    %c0 = arith.constant 0 : index
    %c0_0 = arith.constant 0 : index
    %0 = vector.load %arg2[%c0, %c0_0] : memref<8x32xf32, #tpu.memory_space<vmem>>, vector<8x32xf32>
    %c0_1 = arith.constant 0 : index
    %c0_2 = arith.constant 0 : index
    %1 = vector.load %arg3[%c0_1, %c0_2] : memref<16x32xf32, #tpu.memory_space<vmem>>, vector<16x32xf32>
    %cst = arith.constant dense<0.000000e+00> : vector<8x16xf32>
    %2 = tpu.matmul %0, %1, %cst {dimension_numbers = #tpu.dot_dimension_numbers<[1], [1], [0], [0], [0, 0, 1, 0], [], []>} : vector<8x32xf32>, vector<16x32xf32>, vector<8x16xf32> -> vector<8x16xf32>
    %cst_3 = arith.constant 0.000000e+00 : f32
    %3 = vector.broadcast %cst_3 : f32 to vector<8x16xf32>
    %4 = arith.maximumf %2, %3 : vector<8x16xf32>
    %c0_4 = arith.constant 0 : index
    %c0_5 = arith.constant 0 : index
    %5 = vector.load %arg4[%c0_4, %c0_5] : memref<8x16xf32, #tpu.memory_space<vmem>>, vector<8x16xf32>
    tpu.vector_store %arg4[%c0_4, %c0_5], %4 {strides = array<i32>} : memref<8x16xf32, #tpu.memory_space<vmem>>, vector<8x16xf32>,
    %cst_6 = arith.constant 0.000000e+00 : f32
    %6 = vector.broadcast %cst_6 : f32 to vector<8x16xf32>
    %7 = arith.cmpf ole, %2, %6 : vector<8x16xf32>
    %8 = arith.extui %7 : vector<8x16xi1> to vector<8x16xi8>
    %c0_7 = arith.constant 0 : index
    %c0_8 = arith.constant 0 : index
    %9 = vector.load %arg5[%c0_7, %c0_8] : memref<8x16xi8, #tpu.memory_space<vmem>>, vector<8x16xi8>
    tpu.vector_store %arg5[%c0_7, %c0_8], %8 {strides = array<i32>} : memref<8x16xi8, #tpu.memory_space<vmem>>, vector<8x16xi8>,
    return
  }
  func.func @transform_0(%arg0: i32, %arg1: i32) -> (i32, i32) {
    %c0_i32 = arith.constant 0 : i32
    %c0_i32_0 = arith.constant 0 : i32
    return %arg0, %c0_i32 : i32, i32
  }
  func.func @transform_1(%arg0: i32, %arg1: i32) -> (i32, i32) {
    %c0_i32 = arith.constant 0 : i32
    %c0_i32_0 = arith.constant 0 : i32
    return %arg1, %c0_i32 : i32, i32
  }
  func.func @transform_2(%arg0: i32, %arg1: i32) -> (i32, i32) {
    %c0_i32 = arith.constant 0 : i32
    return %arg0, %arg1 : i32, i32
  }
  func.func @transform_3(%arg0: i32, %arg1: i32) -> (i32, i32) {
    %c0_i32 = arith.constant 0 : i32
    return %arg0, %arg1 : i32, i32
  }
}

</mosaic_0001>

<bundles_post_ra>
// kernel: tpu_custom_call.1
= control target key start
LH: loop header
LB: loop body
LE: loop exit
PB: predicated region body
PF: predicated region fallthrough
CT: control target
= control target key end

     0   :  { %9 = vsyncpa [#allocation3], 0  ;;  %s381_s0 = inlined_call_operand.hbm [shape: f32[8,32], index: 0, kind: input, shape index: {}]   ;;  %s382_s1 = inlined_call_operand.hbm [shape: f32[16,32], index: 1, kind: input, shape index: {}]   ;;  %s383_s2 = inlined_call_operand.hbm [shape: f32[8,16], index: 2, kind: output, shape index: {0}]   ;;  %s384_s3 = inlined_call_operand.hbm [shape: s8[8,16], index: 3, kind: output, shape index: {1}]  }
   0x1   :  { %10 = vsyncpa [#allocation6], 0 }
   0x2   :  { %11 = vsyncpa [#allocation4], 0 }
   0x3   :  { %12 = vsyncpa [#allocation9], 0  ;;  %s288_s12 = smov [#allocation2]   ;;  %s289_s14 = smov [#allocation5]  }
   0x4   :  { %s19_s13 = sshll.u32 %s288_s12, 4  ;;  %s28_s15 = sshll.u32 %s289_s14, 4  ;;  %s20_s13 = int_to_ptr.vmem [resolvable:$true] %s19_s13  ;;  %s318_s15 = int_to_ptr.vmem [resolvable:$true] %s28_s15 }
   0x5   :  { %s192_s18 = scalar_lea.hbm %s381_s0, 128 }
   0x6   :  { %p193_p0 = scmp.ne.s32.totalorder %s381_s0, %s192_s18  ;;  %p196_p1 = scmp.lt.u32.totalorder %s192_s18, %s381_s0 }
   0x8   :  { %p198_p2 = pnand %p196_p1, %p193_p0 }
   0xa   :  { %201 = shalt.err (!%p198_p2)
}
   0xb   :  { %s202_s23 = scalar_lea.vmem %s20_s13, 128  ;;  %p207_p4 = scmp.lt.s32.totalorder %s20_s13, %s20_s13 }
   0xc   :  { %p203_p3 = scmp.ne.s32.totalorder %s20_s13, %s202_s23  ;;  %p208_p5 = scmp.lt.s32.totalorder %s202_s23, %s202_s23 }
   0xe   :  { %p209_p6 = por %p208_p5, %p207_p4 }
  0x10   :  { %p210_p7 = pnand %p209_p6, %p203_p3 }
  0x12   :  { %213 = shalt.err (!%p210_p7)
}
  0x13   :  { %22 = dma.hbm_to_vmem [thread:$0]  %s381_s0, 128, %s20_s13, [#allocation3]  }
  0x14   :  { %s214_s28 = scalar_lea.hbm %s382_s1, 256 }
  0x15   :  { %p215_p8 = scmp.ne.s32.totalorder %s382_s1, %s214_s28  ;;  %p218_p9 = scmp.lt.u32.totalorder %s214_s28, %s382_s1 }
  0x17   :  { %p220_p10 = pnand %p218_p9, %p215_p8 }
  0x19   :  { %223 = shalt.err (!%p220_p10)
}
  0x1a   :  { %s224_s6 = scalar_lea.vmem %s318_s15, 256  ;;  %p229_p12 = scmp.lt.s32.totalorder %s318_s15, %s318_s15 }
  0x1b   :  { %p225_p11 = scmp.ne.s32.totalorder %s318_s15, %s224_s6  ;;  %p230_p13 = scmp.lt.s32.totalorder %s224_s6, %s224_s6 }
  0x1d   :  { %p231_p0 = por %p230_p13, %p229_p12 }
  0x1f   :  { %p232_p1 = pnand %p231_p0, %p225_p11 }
  0x21   :  { %235 = shalt.err (!%p232_p1)
}
  0x22   :  { %s290_s0 = smov 128   ;;  %s291_s7 = smov 8  }
  0x23   :  { %34 = dma.hbm_to_vmem [thread:$0]  %s382_s1, 256, %s318_s15, [#allocation6], %s290_s0, %s290_s0, %s291_s7  }
  0x24   :  { %280 = dma.done.wait [#allocation3], 128  }
  0x25   :  { %281 = vsyncadd [#allocation3], 4294967168 }
  0x26   :  { %282 = dma.done.wait [#allocation6], 256  }
  0x27   :  { %283 = vsyncadd [#allocation6], 4294967040  ;;  %v292_v0 = vmov 0.0|0.0   ;;  %vm293_vm0 = vmmov 0   ;;  %v294_v1 = vmov 0.0   ;;  %vm46_vm1 = vcmask 261120  }
  0x28   :  { %178 = vmatprep.subr.bf16.mxu0 %v292_v0  ;;  %175 = vmatprep.mubr.msk.f32.mxu0 %vm293_vm0, %v294_v1  ;;  %v44_v2 = vld [vmem:[#allocation5] sm:$0xff]  ;;  %v45_v3 = vld [vmem:[#allocation5 + $0x8] sm:$0xff]  ;;  %vm180_vm2 = vmpackc.low %vm46_vm1, %vm46_vm1  ;;  %s295_s10 = smov [#allocation7]   ;;  %vm127_vm3 = vcmask 130048   ;;  %s296_s1 = smov [#allocation8]   ;;  %vm133_vm6 = vcmask 123904  }
  0x29   :  { %v179_v4 = vpack.c.bf16 %v45_v3, %v44_v2  ;;  %v43_v5 = vld [vmem:[#allocation2] sm:$0xff]  ;;  %s141_s11 = sshll.u32 %s295_s10, 4  ;;  %s151_s12 = sshll.u32 %s296_s1, 4  ;;  %v297_v9 = vmov 0   ;;  %s142_s11 = int_to_ptr.vmem [resolvable:$true] %s141_s11  ;;  %s349_s12 = int_to_ptr.vmem [resolvable:$true] %s151_s12 }
  0x2a   :  { %s236_s13 = scalar_lea.vmem %s142_s11, 128  ;;  %p241_p3 = scmp.lt.s32.totalorder %s142_s11, %s142_s11 }
  0x2b   :  { %181 = vmatpush3.bf16.xpose.msk.msra.mxu0 %vm180_vm2, %v179_v4  ;;  %p237_p2 = scmp.ne.s32.totalorder %s142_s11, %s236_s13  ;;  %p242_p4 = scmp.lt.s32.totalorder %s236_s13, %s236_s13 }
  0x2d   :  { %p243_p5 = por %p242_p4, %p241_p3 }
  0x2f   :  { %p244_p6 = pnand %p243_p5, %p237_p2 }
  0x32   :  { %176 = vmatmul.mubr.msk.f32.vlgmr.msra.gmra.mrb[0].mxu0 %vm46_vm1, %v43_v5 }
 0x105   :  { %v122_v6 = vpop.f32.mrb[0].mxu0 }
 0x106   :  { %v126_v7 = vmax.f32 %v122_v6, 0.0  ;;  %vm129_vm4 = vcmp.le.f32.partialorder %v122_v6, 0.0  ;;  %v177_v8 = vpop.f32.mrb[1].mxu0 }
 0x107   :  { %vm130_vm5 = vmpackc.low %vm129_vm4, %vm129_vm4 }
 0x108   :  { %vm131_vm7 = vmpackc.even %vm130_vm5, %vm130_vm5  ;;  %128 = vst.msk [vmem:[#allocation7] sm:$0xff] %vm127_vm3, %v126_v7 }
 0x109   :  { %v132_v10 = vsel %vm131_vm7, 16843009, %v297_v9 }
 0x10a   :  { %247 = shalt.err (!%p244_p6)
}
 0x10b   :  { %s248_s16 = scalar_lea.hbm %s383_s2, 128 }
 0x10c   :  { %p249_p7 = scmp.ne.s32.totalorder %s383_s2, %s248_s16  ;;  %p252_p8 = scmp.lt.u32.totalorder %s248_s16, %s383_s2 }
 0x10e   :  { %p254_p9 = pnand %p252_p8, %p249_p7 }
 0x110   :  { %257 = shalt.err (!%p254_p9)
}
 0x111   :  { %144 = dma.vmem_to_hbm [thread:$0]  %s142_s11, 128, %s383_s2, [#allocation4]   ;;  %134 = vst.msk [vmem:[#allocation8] sm:$0x3] %vm133_vm6, %v132_v10 }
 0x112   :  { %s258_s23 = scalar_lea.vmem %s349_s12, 32  ;;  %p263_p11 = scmp.lt.s32.totalorder %s349_s12, %s349_s12 }
 0x113   :  { %p259_p10 = scmp.ne.s32.totalorder %s349_s12, %s258_s23  ;;  %p264_p12 = scmp.lt.s32.totalorder %s258_s23, %s258_s23 }
 0x115   :  { %p265_p13 = por %p264_p12, %p263_p11 }
 0x117   :  { %p266_p0 = pnand %p265_p13, %p259_p10 }
 0x119   :  { %269 = shalt.err (!%p266_p0)
}
 0x11a   :  { %s270_s26 = scalar_lea.hbm %s384_s3, 32 }
 0x11b   :  { %p271_p1 = scmp.ne.s32.totalorder %s384_s3, %s270_s26  ;;  %p274_p2 = scmp.lt.u32.totalorder %s270_s26, %s384_s3 }
 0x11d   :  { %p276_p3 = pnand %p274_p2, %p271_p1 }
 0x11f   :  { %279 = shalt.err (!%p276_p3)
}
 0x120   :  { %154 = dma.vmem_to_hbm [thread:$0]  %s349_s12, 32, %s384_s3, [#allocation9]  }
 0x121   :  { %284 = dma.done.wait [#allocation4], 128  }
 0x122   :  { %285 = vsyncadd [#allocation4], 4294967168 }
 0x123   :  { %286 = dma.done.wait [#allocation9], 32  }
 0x124   :  { %287 = vsyncadd [#allocation9], 4294967264 }
 0x125   :  { %161 = vsyncpa [#allocation3], 1 }
 0x126   :  { %162 = vsyncpa [#allocation6], 1 }
 0x127   :  { %163 = vsyncpa [#allocation4], 1 }
 0x128   :  { %164 = vsyncpa [#allocation9], 1 }

</bundles_post_ra>
